<compile_context>
chip_gen: v7x
topology: tpu7x:2x2x1
jax: 0.10.0
libtpu: 0.0.40
codegen_flags: <defaults>
</compile_context>

<pallas_src>
import math
import jax
import jax.numpy as jnp
from jax.experimental import pallas as pl
from jax.experimental.pallas import tpu as pltpu


# ----------------------------------------------------------------------------
# Kernel
# ----------------------------------------------------------------------------
def _noisy_linear_kernel(x_ref, xn_ref, wmu_ref, wsig_ref, eps_out_ref, bias_ref,
                         o_ref, acc_mu_ref, acc_sig_ref):
    k = pl.program_id(2)

    @pl.when(k == 0)
    def _():
        acc_mu_ref[...] = jnp.zeros_like(acc_mu_ref)
        acc_sig_ref[...] = jnp.zeros_like(acc_sig_ref)

    # bf16 MXU feeds, f32 accumulation.
    acc_mu_ref[...] += jnp.dot(x_ref[...], wmu_ref[...],
                               preferred_element_type=jnp.float32)
    acc_sig_ref[...] += jnp.dot(xn_ref[...], wsig_ref[...],
                                preferred_element_type=jnp.float32)

    @pl.when(k == pl.num_programs(2) - 1)
    def _():
        # eps_out scale + noisy-bias add applied exactly once, at finalize.
        o_ref[...] = (acc_mu_ref[...]
                      + acc_sig_ref[...] * eps_out_ref[...]
                      + bias_ref[...]).astype(o_ref.dtype)


# ----------------------------------------------------------------------------
# Host-side helpers
# ----------------------------------------------------------------------------
def _round_up(x, m):
    return (x + m - 1) // m * m


def choose_tiles(batch, in_features, out_features, *, tm=128, tn=256, tk=512):
    """Clamp default tiles to the (padded) problem and keep >=2 parallel blocks
    so v7x's second TensorCore is never idle.  All values stay multiples of
    (8, 128) as required by TPU tiling."""
    tm = min(tm, _round_up(batch, 8))
    tk = min(tk, _round_up(in_features, 128))
    tn = min(tn, _round_up(out_features, 128))
    bp = _round_up(batch, tm)
    np_ = _round_up(out_features, tn)
    # v7x: 2 TCs shard the "parallel" axes; ensure the (M, N) grid has >= 2 blocks.
    while (bp // tm) * (np_ // tn) < 2 and tn > 128:
        tn //= 2
        np_ = _round_up(out_features, tn)
    return tm, tn, tk


def pack_noisy_linear_weights(weight_mu, weight_sigma, *, tn, tk):
    """One-time relayout: (out, in) f32 -> padded (in, out) bf16 for the MXU feed.
    Call at init / after every optimizer step, NOT per forward."""
    out_f, in_f = weight_mu.shape
    kp = _round_up(in_f, tk)
    np_ = _round_up(out_f, tn)
    wmu_t = jnp.pad(weight_mu.T.astype(jnp.bfloat16),
                    ((0, kp - in_f), (0, np_ - out_f)))
    wsig_t = jnp.pad(weight_sigma.T.astype(jnp.bfloat16),
                     ((0, kp - in_f), (0, np_ - out_f)))
    return wmu_t, wsig_t


def noisy_linear_pallas(x, wmu_t, wsig_t, bias_mu, bias_sigma, eps_in, eps_out,
                        *, out_features, tm, tn, tk, out_dtype=jnp.float32):
    """x: (B, in) f32.  wmu_t/wsig_t: pre-packed padded (Kp, Np) bf16 (in, out)
    layout from pack_noisy_linear_weights.  biases/eps_out: (out,), eps_in: (in,)."""
    B, in_f = x.shape
    Kp, Np = wmu_t.shape
    Bp = _round_up(B, tm)

    # O(B*K) + O(N) noise math in f32 on the VPU-friendly XLA side, once per call.
    x32 = x.astype(jnp.float32)
    xn32 = x32 * eps_in.reshape(1, in_f).astype(jnp.float32)
    x_p = jnp.pad(x32.astype(jnp.bfloat16), ((0, Bp - B), (0, Kp - in_f)))
    xn_p = jnp.pad(xn32.astype(jnp.bfloat16), ((0, Bp - B), (0, Kp - in_f)))

    eps_out_p = jnp.pad(eps_out.reshape(1, out_features).astype(jnp.float32),
                        ((0, 0), (0, Np - out_features)))
    b_noisy = (bias_mu + bias_sigma * eps_out).reshape(1, out_features)
    b_p = jnp.pad(b_noisy.astype(jnp.float32), ((0, 0), (0, Np - out_features)))

    grid = (Bp // tm, Np // tn, Kp // tk)

    # Explicit VMEM budget: 2x-buffered inputs + f32 output + two f32 accumulators.
    vmem_bytes = (2 * (2 * tm * tk * 2)        # x, xn tiles (bf16)
                  + 2 * (2 * tk * tn * 2)      # two weight tiles (bf16)
                  + 2 * (2 * tn * 4)           # eps_out + bias rows (f32)
                  + 2 * tm * tn * 4            # output tile (f32)
                  + 2 * tm * tn * 4)           # two accumulators (f32)
    vmem_limit = int(min(max(2 * vmem_bytes, 16 * 1024 * 1024), 32 * 1024 * 1024))

    cost = pl.CostEstimate(
        flops=2 * (2 * Bp * Kp * Np),
        transcendentals=0,
        bytes_accessed=(x_p.size + xn_p.size) * 2 + (wmu_t.size + wsig_t.size) * 2
                       + Bp * Np * jnp.dtype(out_dtype).itemsize,
    )

    out_p = pl.pallas_call(
        _noisy_linear_kernel,
        out_shape=jax.ShapeDtypeStruct((Bp, Np), out_dtype),
        grid_spec=pltpu.PrefetchScalarGridSpec(
            num_scalar_prefetch=0,
            grid=grid,
            in_specs=[
                pl.BlockSpec((tm, tk), lambda i, j, k: (i, k)),   # x (bf16)
                pl.BlockSpec((tm, tk), lambda i, j, k: (i, k)),   # x*eps_in (bf16)
                pl.BlockSpec((tk, tn), lambda i, j, k: (k, j)),   # Wmu^T  (bf16)
                pl.BlockSpec((tk, tn), lambda i, j, k: (k, j)),   # Wsig^T (bf16)
                pl.BlockSpec((1, tn),  lambda i, j, k: (0, j)),   # eps_out row (f32)
                pl.BlockSpec((1, tn),  lambda i, j, k: (0, j)),   # noisy bias row (f32)
            ],
            out_specs=pl.BlockSpec((tm, tn), lambda i, j, k: (i, j)),
            scratch_shapes=[pltpu.VMEM((tm, tn), jnp.float32),
                            pltpu.VMEM((tm, tn), jnp.float32)],
        ),
        compiler_params=pltpu.CompilerParams(
            dimension_semantics=("parallel", "parallel", "arbitrary"),
            vmem_limit_bytes=vmem_limit),
        cost_estimate=cost,
    )(x_p, xn_p, wmu_t, wsig_t, eps_out_p, b_p)

    return out_p[:B, :out_features]


# ----------------------------------------------------------------------------
# Module-level plumbing (init / noise / forward) mirroring the PyTorch module
# ----------------------------------------------------------------------------
def scale_noise(key, size):
    # f(x) = sign(x) * sqrt(|x|),  x ~ N(0, 1)   (matches NoisyLinear.scale_noise)
    x = jax.random.normal(key, (size,), dtype=jnp.float32)
    return jnp.sign(x) * jnp.sqrt(jnp.abs(x))


def init_noisy_linear_params(key, in_features, out_features, sigma_init=0.5):
    std = math.sqrt(1.0 / in_features)
    k_w, k_b = jax.random.split(key)
    weight_mu = jax.random.uniform(k_w, (out_features, in_features),
                                   minval=-std, maxval=std, dtype=jnp.float32)
    bias_mu = jax.random.uniform(k_b, (out_features,),
                                 minval=-std, maxval=std, dtype=jnp.float32)
    weight_sigma = jnp.full((out_features, in_features), sigma_init * std, jnp.float32)
    bias_sigma = jnp.full((out_features,), sigma_init * std, jnp.float32)
    return weight_mu, weight_sigma, bias_mu, bias_sigma


def noisy_linear_forward(packed, raw_biases, x, noise_key, *,
                         in_features, out_features, tm, tn, tk):
    """Reproduces NoisyLinear.forward: fresh factored noise + noisy linear.
    `packed` = (wmu_t, wsig_t) from pack_noisy_linear_weights (hoisted relayout)."""
    wmu_t, wsig_t = packed
    bias_mu, bias_sigma = raw_biases
    k_i, k_j = jax.random.split(noise_key)
    eps_in = scale_noise(k_i, in_features)     # epsilon_i
    eps_out = scale_noise(k_j, out_features)   # epsilon_j
    out = noisy_linear_pallas(x, wmu_t, wsig_t, bias_mu, bias_sigma,
                              eps_in, eps_out, out_features=out_features,
                              tm=tm, tn=tn, tk=tk)
    return out, (eps_in, eps_out)


if __name__ == "__main__":
    key = jax.random.PRNGKey(0)
    k_param, k_input, k_noise = jax.random.split(key, 3)

    # Small but non-trivial shapes: exercises K padding (160 -> 256) and
    # the v7x >=2-parallel-block heuristic (tn drops 256 -> 128 at B=8).
    batch, in_features, out_features = 8, 160, 256
    weight_mu, weight_sigma, bias_mu, bias_sigma = init_noisy_linear_params(
        k_param, in_features, out_features, sigma_init=0.5)
    x = jax.random.normal(k_input, (batch, in_features), dtype=jnp.float32)

    # Pure-JAX f32 reference with the same noise draw. Kernel uses bf16 MXU feeds
    # (x / x*eps_in / weights), so tolerance is at the bf16 level (~1e-2 rel).
    def reference(eps_in, eps_out):
        w_ref = weight_mu + weight_sigma * jnp.outer(eps_out, eps_in)
        b_ref = bias_mu + bias_sigma * eps_out
        return x @ w_ref.T + b_ref

    # --- Config A: default (auto-chosen) large tiles, relayout hoisted to init.
    tm, tn, tk = choose_tiles(batch, in_features, out_features)
    packed = pack_noisy_linear_weights(weight_mu, weight_sigma, tn=tn, tk=tk)
    out_a, (eps_in_a, eps_out_a) = noisy_linear_forward(
        packed, (bias_mu, bias_sigma), x, k_noise,
        in_features=in_features, out_features=out_features, tm=tm, tn=tn, tk=tk)
    out_a = jax.block_until_ready(out_a)
    ref_a = reference(eps_in_a, eps_out_a)
    assert out_a.shape == ref_a.shape, "shape mismatch vs reference (config A)"
    assert jnp.allclose(out_a, ref_a, atol=2e-2, rtol=2e-2), "mismatch vs reference (config A)"

    # --- Config B: small tiles to exercise the multi-step K accumulation path.
    tm_b, tn_b, tk_b = 8, 128, 128
    packed_b = pack_noisy_linear_weights(weight_mu, weight_sigma, tn=tn_b, tk=tk_b)
    out_b, (eps_in_b, eps_out_b) = noisy_linear_forward(
        packed_b, (bias_mu, bias_sigma), x, k_noise,
        in_features=in_features, out_features=out_features, tm=tm_b, tn=tn_b, tk=tk_b)
    out_b = jax.block_until_ready(out_b)
    ref_b = reference(eps_in_b, eps_out_b)
    assert out_b.shape == ref_b.shape, "shape mismatch vs reference (config B)"
    assert jnp.allclose(out_b, ref_b, atol=2e-2, rtol=2e-2), "mismatch vs reference (config B)"

    print("KERNEL_OK")
</pallas_src>

<mosaic_0001>
module attributes {stable_mosaic.version = 11 : i64} {
  func.func @_noisy_linear_kernel(%arg0: i32, %arg1: i32, %arg2: i32, %arg3: memref<8x256xbf16, #tpu.memory_space<vmem>>, %arg4: memref<8x256xbf16, #tpu.memory_space<vmem>>, %arg5: memref<256x128xbf16, #tpu.memory_space<vmem>>, %arg6: memref<256x128xbf16, #tpu.memory_space<vmem>>, %arg7: memref<1x128xf32, #tpu.memory_space<vmem>>, %arg8: memref<1x128xf32, #tpu.memory_space<vmem>>, %arg9: memref<8x128xf32, #tpu.memory_space<vmem>>, %arg10: memref<8x128xf32, #tpu.memory_space<vmem>>, %arg11: memref<8x128xf32, #tpu.memory_space<vmem>>) attributes {dimension_semantics = [#tpu.dimension_semantics<parallel>, #tpu.dimension_semantics<parallel>, #tpu.dimension_semantics<arbitrary>], iteration_bounds = array<i64: 1, 2, 1>, scalar_prefetch = 0 : i64, scratch_operands = 2 : i64, tpu.core_type = #tpu.core_type<tc>, window_params = [{transform_indices = @transform_0, window_bounds = array<i64: 8, 256>}, {transform_indices = @transform_1, window_bounds = array<i64: 8, 256>}, {transform_indices = @transform_2, window_bounds = array<i64: 256, 128>}, {transform_indices = @transform_3, window_bounds = array<i64: 256, 128>}, {transform_indices = @transform_4, window_bounds = array<i64: 1, 128>}, {transform_indices = @transform_5, window_bounds = array<i64: 1, 128>}, {transform_indices = @transform_6, window_bounds = array<i64: 8, 128>}]} {
    %c0_i32 = arith.constant 0 : i32
    %0 = arith.cmpi eq, %arg2, %c0_i32 : i32
    %1 = arith.extui %0 : i1 to i32
    %c0_i32_0 = arith.constant 0 : i32
    %2 = arith.cmpi ne, %1, %c0_i32_0 : i32
    scf.if %2 {
      %cst_19 = arith.constant 0.000000e+00 : f32
      %18 = vector.broadcast %cst_19 : f32 to vector<8x128xf32>
      %c0_20 = arith.constant 0 : index
      %c0_21 = arith.constant 0 : index
      %19 = vector.load %arg10[%c0_20, %c0_21] : memref<8x128xf32, #tpu.memory_space<vmem>>, vector<8x128xf32>
      tpu.vector_store %arg10[%c0_20, %c0_21], %18 {strides = array<i32>} : memref<8x128xf32, #tpu.memory_space<vmem>>, vector<8x128xf32>,
      %cst_22 = arith.constant 0.000000e+00 : f32
      %20 = vector.broadcast %cst_22 : f32 to vector<8x128xf32>
      %c0_23 = arith.constant 0 : index
      %c0_24 = arith.constant 0 : index
      %21 = vector.load %arg11[%c0_23, %c0_24] : memref<8x128xf32, #tpu.memory_space<vmem>>, vector<8x128xf32>
      tpu.vector_store %arg11[%c0_23, %c0_24], %20 {strides = array<i32>} : memref<8x128xf32, #tpu.memory_space<vmem>>, vector<8x128xf32>,
    } else {
    }
    %c0 = arith.constant 0 : index
    %c0_1 = arith.constant 0 : index
    %3 = vector.load %arg10[%c0, %c0_1] : memref<8x128xf32, #tpu.memory_space<vmem>>, vector<8x128xf32>
    %c0_2 = arith.constant 0 : index
    %c0_3 = arith.constant 0 : index
    %4 = vector.load %arg3[%c0_2, %c0_3] : memref<8x256xbf16, #tpu.memory_space<vmem>>, vector<8x256xbf16>
    %c0_4 = arith.constant 0 : index
    %c0_5 = arith.constant 0 : index
    %5 = vector.load %arg5[%c0_4, %c0_5] : memref<256x128xbf16, #tpu.memory_space<vmem>>, vector<256x128xbf16>
    %cst = arith.constant dense<0.000000e+00> : vector<8x128xf32>
    %6 = tpu.matmul %4, %5, %cst {dimension_numbers = #tpu.dot_dimension_numbers<[1], [0], [0], [1], [0, 0, 1, 1], [], []>} : vector<8x256xbf16>, vector<256x128xbf16>, vector<8x128xf32> -> vector<8x128xf32>
    %7 = arith.addf %3, %6 : vector<8x128xf32>
    %c0_6 = arith.constant 0 : index
    %c0_7 = arith.constant 0 : index
    %8 = vector.load %arg10[%c0_6, %c0_7] : memref<8x128xf32, #tpu.memory_space<vmem>>, vector<8x128xf32>
    tpu.vector_store %arg10[%c0_6, %c0_7], %7 {strides = array<i32>} : memref<8x128xf32, #tpu.memory_space<vmem>>, vector<8x128xf32>,
    %c0_8 = arith.constant 0 : index
    %c0_9 = arith.constant 0 : index
    %9 = vector.load %arg11[%c0_8, %c0_9] : memref<8x128xf32, #tpu.memory_space<vmem>>, vector<8x128xf32>
    %c0_10 = arith.constant 0 : index
    %c0_11 = arith.constant 0 : index
    %10 = vector.load %arg4[%c0_10, %c0_11] : memref<8x256xbf16, #tpu.memory_space<vmem>>, vector<8x256xbf16>
    %c0_12 = arith.constant 0 : index
    %c0_13 = arith.constant 0 : index
    %11 = vector.load %arg6[%c0_12, %c0_13] : memref<256x128xbf16, #tpu.memory_space<vmem>>, vector<256x128xbf16>
    %cst_14 = arith.constant dense<0.000000e+00> : vector<8x128xf32>
    %12 = tpu.matmul %10, %11, %cst_14 {dimension_numbers = #tpu.dot_dimension_numbers<[1], [0], [0], [1], [0, 0, 1, 1], [], []>} : vector<8x256xbf16>, vector<256x128xbf16>, vector<8x128xf32> -> vector<8x128xf32>
    %13 = arith.addf %9, %12 : vector<8x128xf32>
    %c0_15 = arith.constant 0 : index
    %c0_16 = arith.constant 0 : index
    %14 = vector.load %arg11[%c0_15, %c0_16] : memref<8x128xf32, #tpu.memory_space<vmem>>, vector<8x128xf32>
    tpu.vector_store %arg11[%c0_15, %c0_16], %13 {strides = array<i32>} : memref<8x128xf32, #tpu.memory_space<vmem>>, vector<8x128xf32>,
    %c0_i32_17 = arith.constant 0 : i32
    %15 = arith.cmpi eq, %arg2, %c0_i32_17 : i32
    %16 = arith.extui %15 : i1 to i32
    %c0_i32_18 = arith.constant 0 : i32
    %17 = arith.cmpi ne, %16, %c0_i32_18 : i32
    scf.if %17 {
      %c0_19 = arith.constant 0 : index
      %c0_20 = arith.constant 0 : index
      %18 = vector.load %arg10[%c0_19, %c0_20] : memref<8x128xf32, #tpu.memory_space<vmem>>, vector<8x128xf32>
      %c0_21 = arith.constant 0 : index
      %c0_22 = arith.constant 0 : index
      %19 = vector.load %arg11[%c0_21, %c0_22] : memref<8x128xf32, #tpu.memory_space<vmem>>, vector<8x128xf32>
      %c0_23 = arith.constant 0 : index
      %c0_24 = arith.constant 0 : index
      %20 = vector.load %arg7[%c0_23, %c0_24] : memref<1x128xf32, #tpu.memory_space<vmem>>, vector<1x128xf32>
      %21 = vector.broadcast %20 : vector<1x128xf32> to vector<8x128xf32>
      %22 = arith.mulf %19, %21 : vector<8x128xf32>
      %23 = arith.addf %18, %22 : vector<8x128xf32>
      %c0_25 = arith.constant 0 : index
      %c0_26 = arith.constant 0 : index
      %24 = vector.load %arg8[%c0_25, %c0_26] : memref<1x128xf32, #tpu.memory_space<vmem>>, vector<1x128xf32>
      %25 = vector.broadcast %24 : vector<1x128xf32> to vector<8x128xf32>
      %26 = arith.addf %23, %25 : vector<8x128xf32>
      %c0_27 = arith.constant 0 : index
      %c0_28 = arith.constant 0 : index
      %27 = vector.load %arg9[%c0_27, %c0_28] : memref<8x128xf32, #tpu.memory_space<vmem>>, vector<8x128xf32>
      tpu.vector_store %arg9[%c0_27, %c0_28], %26 {strides = array<i32>} : memref<8x128xf32, #tpu.memory_space<vmem>>, vector<8x128xf32>,
    } else {
    }
    return
  }
  func.func @transform_0(%arg0: i32, %arg1: i32, %arg2: i32) -> (i32, i32) {
    %c0_i32 = arith.constant 0 : i32
    return %arg0, %arg2 : i32, i32
  }
  func.func @transform_1(%arg0: i32, %arg1: i32, %arg2: i32) -> (i32, i32) {
    %c0_i32 = arith.constant 0 : i32
    return %arg0, %arg2 : i32, i32
  }
  func.func @transform_2(%arg0: i32, %arg1: i32, %arg2: i32) -> (i32, i32) {
    %c0_i32 = arith.constant 0 : i32
    return %arg2, %arg1 : i32, i32
  }
  func.func @transform_3(%arg0: i32, %arg1: i32, %arg2: i32) -> (i32, i32) {
    %c0_i32 = arith.constant 0 : i32
    return %arg2, %arg1 : i32, i32
  }
  func.func @transform_4(%arg0: i32, %arg1: i32, %arg2: i32) -> (i32, i32) {
    %c0_i32 = arith.constant 0 : i32
    %c0_i32_0 = arith.constant 0 : i32
    return %c0_i32, %arg1 : i32, i32
  }
  func.func @transform_5(%arg0: i32, %arg1: i32, %arg2: i32) -> (i32, i32) {
    %c0_i32 = arith.constant 0 : i32
    %c0_i32_0 = arith.constant 0 : i32
    return %c0_i32, %arg1 : i32, i32
  }
  func.func @transform_6(%arg0: i32, %arg1: i32, %arg2: i32) -> (i32, i32) {
    %c0_i32 = arith.constant 0 : i32
    return %arg0, %arg1 : i32, i32
  }
}

</mosaic_0001>

<bundles_post_ra>
// kernel: tpu_custom_call.1
= control target key start
LH: loop header
LB: loop body
LE: loop exit
PB: predicated region body
PF: predicated region fallthrough
CT: control target
= control target key end

     0   :  { %s1795_s0 = inlined_call_operand.hbm [shape: bf16[8,256], index: 0, kind: input, shape index: {}]   ;;  %s1796_s1 = inlined_call_operand.hbm [shape: bf16[8,256], index: 1, kind: input, shape index: {}]   ;;  %s1797_s2 = inlined_call_operand.hbm [shape: bf16[256,256], index: 2, kind: input, shape index: {}]   ;;  %s1798_s3 = inlined_call_operand.hbm [shape: bf16[256,256], index: 3, kind: input, shape index: {}]   ;;  %s1799_s4 = inlined_call_operand.vmem [shape: f32[1,256], index: 4, kind: input, shape index: {}]   ;;  %s1800_s5 = inlined_call_operand.vmem [shape: f32[1,256], index: 5, kind: input, shape index: {}]   ;;  %s1801_s6 = inlined_call_operand.hbm [shape: f32[8,256], index: 6, kind: output, shape index: {}]  }
   0x1   :  { %1818 = sst [smem:[#allocation22_spill]] %s1795_s0 }
   0x2   :  { %1819 = sst [smem:[#allocation23_spill]] %s1797_s2 }
   0x3   :  { %1820 = sst [smem:[#allocation24_spill]] %s1801_s6 }
   0x4   :  { %11 = vsyncpa [#allocation5], 0 }
   0x5   :  { %12 = vsyncpa [#allocation8], 0 }
   0x6   :  { %13 = vsyncpa [#allocation6], 0 }
   0x7   :  { %15 = vsyncpa [#allocation6 + $0x1], 0  ;;  %s1453_s21 = smov 0   ;;  %s1455_s22 = smov 0  }
   0x8   :  { %s1457_s23 = smov 0   ;;  %s1459_s24 = smov 0  }
   0x9   :  { %s1461_s25 = smov 0   ;;  %s1463_s26 = smov 0  }
   0xa LB: > { %1821 = sst [smem:[#allocation16_spill]] %s1388_s21  ;;  %s1484_s27 = sadd.s32 4294967295, %s1408_s26   ;;  %s1408_s26 = sphi %s1463_s26, %s21_s26   ;;  %s1404_s25 = sphi %s1461_s25, %s1866_s25   ;;  %s1400_s24 = sphi %s1459_s24, %s1865_s24   ;;  %s1396_s23 = sphi %s1457_s23, %s1861_s23   ;;  %s1392_s22 = sphi %s1455_s22, %s1864_s22   ;;  %s1388_s21 = sphi %s1453_s21, %s1863_s21  }
   0xb   : > { %1822 = sst [smem:[#allocation17_spill]] %s1396_s23  ;;  %s974_s28 = sadd.s32 4294967294, %s1408_s26  }
   0xc   : > { %1823 = sst [smem:[#allocation18_spill]] %s1408_s26  ;;  %p112_p0 = scmp.ne.s32.totalorder %s1396_s23, %s1392_s22 }
   0xd   : > { %p113_p1 = scmp.eq.s32.totalorder %s1408_s26, 0  ;;  %p118_p2 = scmp.ne.s32.totalorder %s1392_s22, %s1388_s21 }
   0xe   : > { %p1802_p3 = scmp.eq.s32.totalorder %s1484_s27, 0  ;;  %p224_p4 = scmp.eq.s32.totalorder %s1484_s27, 1 }
   0xf   : > { %p1495_p5 = por %p113_p1, %p112_p0  ;;  %p230_p6 = scmp.eq.s32.totalorder %s974_s28, 1 }
  0x10   : > { %p1501_p7 = por %p1802_p3, %p118_p2  ;;  %p1505_p8 = por %p224_p4, %p112_p0 }
  0x11   : > { %p1509_p9 = por %p230_p6, %p118_p2  ;;  %p975_p10 = scmp.ge.s32.totalorder %s1408_s26, 1 }
  0x12   : > { %s1825_s7 = scalar_select %p1501_p7, 1, 0 }
  0x13   : > { %s1826_s8 = scalar_select %p1505_p8, 1, 0 }
  0x14   : > { %s1827_s9 = scalar_select %p1509_p9, 1, 0 }
  0x15   : > { %p237_p11 = scmp.lt.s32.totalorder %s1408_s26, 3  ;;  %s1410_s11 = smov [#allocation4]  }
  0x16   : > { %1828 = sst [smem:[#allocation19_spill]] %s1827_s9  ;;  %s255_s12 = sshll.u32 %s1410_s11, 4  ;;  %s256_s12 = int_to_ptr.vmem [resolvable:$true] %s255_s12 }
  0x17   : > { %p1516_p13 = pnand %p975_p10, %p237_p11  ;;  %p1109_p1 = scmp.lt.s32.totalorder %s1408_s26, 2 }
  0x18   : > { %s36_s15 = sadd.s32 1, %s1404_s25  ;;  %s1833_s0 = sld [smem:[#allocation22_spill]] }
  0x19   : > { %s1829_s10 = scalar_select %p1516_p13, 1, 0 }
  0x1a   : > { %p1089_p0 = pneg %p1516_p13  ;;  %p1525_p4 = pnand %p1109_p1, %p1495_p5 }
  0x1b   : > { %p1536_p6 = scmp.ge.s32.totalorder %s36_s15, 2 }
  0x1c   : > { %s1830_s13 = scalar_select %p1525_p4, 1, 0 }
  0x1d   : > { %p1531_p2 = pnand %p1089_p0, %p1802_p3 }
  0x1e   : > { %s1832_s16 = scalar_select %p1536_p6, 1, 0 }
  0x1f   : > { %s1202_s20 = scalar_lea.hbm %s1833_s0, 128  ;;  %p1809_p10 = pneg %p1531_p2 }
  0x20   : > { %p1203_p5 = scmp.ne.s32.totalorder %s1833_s0, %s1202_s20  ;;  %p1209_p0 = scmp.lt.u32.totalorder %s1202_s20, %s1833_s0 }
  0x22   : > { %p1205_p11 = pnand %p1809_p10, %p1203_p5 }
  0x24   : > { %p1206_p1 = pneg %p1205_p11 }
  0x26   : > { %p1211_p12 = pnand %p1209_p0, %p1206_p1 }
  0x28   : > { %1214 = shalt.err (!%p1211_p12)
}
  0x29   : > { %s1215_s17 = scalar_lea.vmem %s256_s12, 128  ;;  %p1223_p7 = scmp.lt.s32.totalorder %s256_s12, %s256_s12 }
  0x2a   : > { %p1216_p3 = scmp.ne.s32.totalorder %s256_s12, %s1215_s17  ;;  %p1224_p13 = scmp.lt.s32.totalorder %s1215_s17, %s1215_s17 }
  0x2c   : > { %p1218_p9 = pnand %p1216_p3, %p1809_p10  ;;  %p1225_p4 = por %p1224_p13, %p1223_p7 }
  0x2e   : > { %p1219_p8 = pneg %p1218_p9 }
  0x30   : > { %p1226_p6 = pnand %p1225_p4, %p1219_p8 }
  0x32   : > { %1229 = shalt.err (!%p1226_p6)
}
  0x33   : > { %1092 = dma.hbm_to_vmem [thread:$0]  (!%p1531_p2), %s1833_s0, 128, %s256_s12, [#allocation5]  }
  0x34   : > { %p1834_p3 = scmp.ne.s32.totalorder %s1832_s16, 0  ;;  %s284_s29 = sand.u32 1, %s1396_s23  }
  0x35   : > { %s1570_s20 = sshll.u32 %s284_s29, 7  ;;  %s1808_s28 = sshll.u32 %s1404_s25, 6 }
  0x36   : > { %s1868_s15 = smov (%p1834_p3, %s36_s15), 0  ;;  %s286_s30 = scalar_lea.vmem [#allocation9], %s1570_s20 }
  0x37   : > { %1835 = sst [smem:[#allocation20_spill]] %s1868_s15  ;;  %s101_s17 = ssub.s32 %s1404_s25, %s1868_s15 }
  0x38   : > { %p103_p7 = scmp.eq.s32.totalorder %s101_s17, 0  ;;  %s295_s11 = sshll.u32 %s286_s30, 4  ;;  %s1586_s11 = int_to_ptr.vmem [resolvable:$true] %s295_s11 }
  0x39   : > { %s1836_s18 = sadd.s32 1, %s1396_s23  ;;  %s1838_s2 = sld [smem:[#allocation23_spill]] }
  0x3a   : > { %s1577_s19 = scalar_select %p103_p7, %s1396_s23, %s1836_s18  }
  0x3b   : > { %s1839_s29 = sand.u32 1, %s1408_s26   ;;  %p1840_p9 = scmp.ne.s32.totalorder %s1830_s13, 0 }
  0x3c   : > { %1837 = sst [smem:[#allocation21_spill]] %s1577_s19  ;;  %s1590_s17 = scalar_lea.sflag [#allocation5], %s1839_s29 }
  0x3d   : > { %p1816_p12 = pneg %p1840_p9 }
  0x3f   : > { %s1584_s16 = scalar_lea.hbm %s1838_s2, %s1808_s28  ;;  %s1235_s18 = scalar_lea.hbm %s1838_s2, 4096 }
  0x40   : > { %s1230_s0 = scalar_lea.hbm %s1584_s16, 2048  ;;  %p1236_p6 = scmp.lt.u32.totalorder %s1584_s16, %s1838_s2 }
  0x41   : > { %p1231_p8 = scmp.ne.s32.totalorder %s1584_s16, %s1230_s0  ;;  %p1237_p5 = scmp.lt.u32.totalorder %s1235_s18, %s1230_s0 }
  0x42   : > { %p1239_p1 = scmp.lt.u32.totalorder %s1230_s0, %s1584_s16 }
  0x43   : > { %p1233_p13 = pnand %p1816_p12, %p1231_p8  ;;  %p1238_p11 = por %p1237_p5, %p1236_p6 }
  0x45   : > { %p1234_p4 = pneg %p1233_p13  ;;  %p1240_p0 = por %p1239_p1, %p1238_p11 }
  0x47   : > { %p1241_p3 = pnand %p1240_p0, %p1234_p4 }
  0x49   : > { %1244 = shalt.err (!%p1241_p3)
}
  0x4a   : > { %s1245_s29 = scalar_lea.vmem %s1586_s11, 2048  ;;  %s1411_s9 = smov [#allocation9]  }
  0x4b   : > { %p1246_p7 = scmp.ne.s32.totalorder %s1586_s11, %s1245_s29  ;;  %s1250_s30 = sshll.u32 %s1411_s9, 4  ;;  %s1251_s30 = int_to_ptr.vmem [resolvable:$false] %s1250_s30 }
  0x4c   : > { %s1252_s28 = scalar_lea.vmem %s1251_s30, 4096  ;;  %p1253_p10 = scmp.lt.s32.totalorder %s1586_s11, %s1251_s30 }
  0x4d   : > { %p1248_p8 = pnand %p1246_p7, %p1816_p12  ;;  %p1254_p6 = scmp.lt.s32.totalorder %s1252_s28, %s1245_s29 }
  0x4f   : > { %p1249_p13 = pneg %p1248_p8  ;;  %p1255_p5 = por %p1254_p6, %p1253_p10 }
  0x51   : > { %p1256_p11 = pnand %p1255_p5, %p1249_p13 }
  0x53   : > { %1259 = shalt.err (!%p1256_p11)
}
  0x54   : > { %s1412_s0 = smov 128   ;;  %s1413_s18 = smov 64  }
  0x55   : > { %s1414_s12 = smov 4   ;;  %s1415_s9 = smov [#allocation7]  }
  0x56   : > { %1099 = dma.hbm_to_vmem [thread:$0]  (!%p1840_p9), %s1584_s16, 2048, %s1586_s11, %s1590_s17, %s1412_s0, %s1413_s18, %s1414_s12  }
  0x57   : > { %s271_s30 = sshll.u32 %s1415_s9, 4  ;;  %s1841_s29 = sshll.u32 %s1404_s25, 6  ;;  %s272_s30 = int_to_ptr.vmem [resolvable:$true] %s271_s30 }
  0x58   : > { %s1626_s15 = scalar_lea.hbm %s1798_s3, %s1841_s29  ;;  %s1260_s26 = scalar_lea.hbm %s1796_s1, 128 }
  0x59   : > { %p1261_p10 = scmp.ne.s32.totalorder %s1796_s1, %s1260_s26  ;;  %p1842_p4 = pneg %p1531_p2 }
  0x5a   : > { %p1267_p3 = scmp.lt.u32.totalorder %s1260_s26, %s1796_s1 }
  0x5b   : > { %p1263_p1 = pnand %p1261_p10, %p1842_p4 }
  0x5d   : > { %p1264_p0 = pneg %p1263_p1 }
  0x5f   : > { %p1269_p7 = pnand %p1267_p3, %p1264_p0 }
  0x61   : > { %1272 = shalt.err (!%p1269_p7)
}
  0x62   : > { %s1273_s2 = scalar_lea.vmem %s272_s30, 128  ;;  %p1843_p13 = pmov %p1842_p4 }
  0x63   : > { %p1274_p8 = scmp.ne.s32.totalorder %s272_s30, %s1273_s2  ;;  %p1281_p11 = scmp.lt.s32.totalorder %s272_s30, %s272_s30 }
  0x64   : > { %p1282_p12 = scmp.lt.s32.totalorder %s1273_s2, %s1273_s2 }
  0x65   : > { %p1276_p6 = pnand %p1274_p8, %p1843_p13 }
  0x66   : > { %p1283_p9 = por %p1282_p12, %p1281_p11 }
  0x67   : > { %p1277_p5 = pneg %p1276_p6 }
  0x69   : > { %p1284_p4 = pnand %p1283_p9, %p1277_p5 }
  0x6b   : > { %1287 = shalt.err (!%p1284_p4)
}
  0x6c   : > { %1095 = dma.hbm_to_vmem [thread:$0]  (!%p1531_p2), %s1796_s1, 128, %s272_s30, [#allocation8]  }
  0x6d   : > { %s309_s23 = scalar_lea.vmem [#allocation10], %s1570_s20  ;;  %s1288_s19 = scalar_lea.hbm %s1626_s15, 2048 }
  0x6e   : > { %s318_s26 = sshll.u32 %s309_s23, 4  ;;  %p1289_p12 = scmp.ne.s32.totalorder %s1626_s15, %s1288_s19  ;;  %s1649_s26 = int_to_ptr.vmem [resolvable:$true] %s318_s26 }
  0x6f   : > { %p1844_p9 = scmp.ne.s32.totalorder %s1830_s13, 0  ;;  %s1293_s29 = scalar_lea.hbm %s1798_s3, 4096 }
  0x70   : > { %p1294_p3 = scmp.lt.u32.totalorder %s1626_s15, %s1798_s3  ;;  %p1295_p7 = scmp.lt.u32.totalorder %s1293_s29, %s1288_s19 }
  0x71   : > { %p1845_p10 = pneg %p1844_p9  ;;  %p1297_p8 = scmp.lt.u32.totalorder %s1288_s19, %s1626_s15 }
  0x72   : > { %p1296_p2 = por %p1295_p7, %p1294_p3 }
  0x73   : > { %p1291_p1 = pnand %p1289_p12, %p1845_p10 }
  0x74   : > { %p1298_p13 = por %p1297_p8, %p1296_p2 }
  0x75   : > { %p1292_p0 = pneg %p1291_p1 }
  0x77   : > { %p1299_p6 = pnand %p1298_p13, %p1292_p0 }
  0x79   : > { %1302 = shalt.err (!%p1299_p6)
}
  0x7a   : > { %s1303_s20 = scalar_lea.vmem %s1649_s26, 2048  ;;  %p1846_p11 = pmov %p1845_p10 }
  0x7b   : > { %p1304_p5 = scmp.ne.s32.totalorder %s1649_s26, %s1303_s20  ;;  %s1416_s30 = smov [#allocation10]  }
  0x7c   : > { %s1308_s16 = sshll.u32 %s1416_s30, 4  ;;  %s1309_s16 = int_to_ptr.vmem [resolvable:$false] %s1308_s16 }
  0x7d   : > { %p1306_p4 = pnand %p1304_p5, %p1846_p11  ;;  %s1310_s2 = scalar_lea.vmem %s1309_s16, 4096 }
  0x7e   : > { %p1311_p10 = scmp.lt.s32.totalorder %s1649_s26, %s1309_s16  ;;  %p1312_p1 = scmp.lt.s32.totalorder %s1310_s2, %s1303_s20 }
  0x7f   : > { %p1307_p12 = pneg %p1306_p4 }
  0x80   : > { %p1313_p3 = por %p1312_p1, %p1311_p10 }
  0x82   : > { %p1314_p7 = pnand %p1313_p3, %p1307_p12 }
  0x84   : > { %1317 = shalt.err (!%p1314_p7)
}
  0x85   : > { %1102 = dma.hbm_to_vmem [thread:$0]  (!%p1844_p9), %s1626_s15, 2048, %s1649_s26, %s1590_s17, %s1412_s0, %s1413_s18, %s1414_s12  }
  0x86   : > { %p1847_p0 = scmp.ne.s32.totalorder %s1829_s10, 0 }
  0x87   : > { %p1848_p2 = scmp.eq.s32.totalorder (!%p1847_p0), %s1484_s27, 0 }
  0x88   : > { %342 = sbr.rel (%p1847_p0) target bundleno = 422 (0x1a6), region = 44 }
  0x8f   : > { %1371 = dma.done.wait (%p1848_p2), [#allocation5], 128   ;;  %p1849_p8 = pmov %p1848_p2 }
  0x90   : > { %p1850_p13 = pmov %p1848_p2 }
  0x91   : > { %1373 = vsyncadd (%p1849_p8), [#allocation5], 4294967168 }
  0x92   : > { %1375 = dma.done.wait (%p1850_p13), [#allocation8], 128   ;;  %p1851_p6 = pmov %p1848_p2 }
  0x93   : > { %s352_s13 = sand.u32 1, %s1484_s27   ;;  %s1690_s15 = sand.u32 1, %s1392_s22  }
  0x94   : > { %1377 = vsyncadd (%p1851_p6), [#allocation8], 4294967168  ;;  %s986_s10 = sshll.u32 %s1690_s15, 7  ;;  %s353_s17 = scalar_lea.sflag [#allocation5], %s352_s13 }
  0x95   : > { %s1693_s0 = scalar_lea.vmem [#allocation9], %s986_s10  ;;  %p1852_p9 = scmp.ne.s32.totalorder %s1825_s7, 0 }
  0x97   : > { %1379 = dma.done.wait (%p1852_p9), %s353_s17, 4096  }
  0x98   : > { %1381 = vsyncadd (%p1852_p9), %s353_s17, 4294963200  ;;  %v1166_v0 = vld [vmem:[%s1693_s0 + $0x40] sm:$0xff]   ;;  %s1700_s18 = scalar_lea.vmem [#allocation10], %s986_s10  ;;  %v1170_v4 = vld [vmem:[%s1693_s0 + $0x48] sm:$0xff]   ;;  %p409_p5 = scmp.lt.s32.totalorder %s1400_s24, 1 }
  0x99   : > { %v1167_v1 = vld [vmem:[%s1700_s18 + $0x40] sm:$0xff]   ;;  %1031 = vmatprep.subr.bf16.mxu0 %v1166_v0  ;;  %v1171_v5 = vld [vmem:[%s1700_s18 + $0x48] sm:$0xff]   ;;  %v1174_v8 = vld [vmem:[%s1693_s0 + $0x50] sm:$0xff]   ;;  %s988_s21 = sshll.u32 %s1690_s15, 3  ;;  %s1028_s14 = sshll.u32 %s1400_s24, 7 }
  0x9a   : > { %v1168_v2 = vld [vmem:[%s1693_s0] sm:$0xff]   ;;  %1053 = vmatprep.subr.bf16.mxu1 %v1167_v1  ;;  %v1172_v6 = vld [vmem:[%s1693_s0 + $0x8] sm:$0xff]   ;;  %v1175_v9 = vld [vmem:[%s1700_s18 + $0x50] sm:$0xff]   ;;  %s410_s27 = scalar_select %p409_p5, %s1400_s24, 1 }
  0x9b   : > { %v1169_v3 = vld [vmem:[%s1700_s18] sm:$0xff]   ;;  %1032 = vmatpush3.bf16.msra.mxu0 %v1168_v2  ;;  %v1173_v7 = vld [vmem:[%s1700_s18 + $0x8] sm:$0xff]   ;;  %v1176_v10 = vld [vmem:[%s1693_s0 + $0x10] sm:$0xff]   ;;  %s404_s9 = scalar_lea.vmem [#allocation11], %s988_s21  ;;  %s1853_s20 = sld [smem:[#allocation24_spill]] }
  0x9c   : > { %1054 = vmatpush3.bf16.msra.mxu1 %v1169_v3  ;;  %1033 = vmatprep.subr.bf16.mxu0 %v1170_v4  ;;  %v1177_v11 = vld [vmem:[%s1700_s18 + $0x10] sm:$0xff]   ;;  %v1178_v12 = vld [vmem:[%s1693_s0 + $0x58] sm:$0xff]   ;;  %v1182_v16 = vld [vmem:[%s1693_s0 + $0x60] sm:$0xff]   ;;  %s411_s6 = scalar_lea.vmem %s1799_s4, %s410_s27  ;;  %s414_s19 = scalar_lea.vmem %s1800_s5, %s410_s27 }
  0x9d   : > { %1055 = vmatprep.subr.bf16.mxu1 %v1171_v5  ;;  %v1179_v13 = vld [vmem:[%s1700_s18 + $0x58] sm:$0xff]   ;;  %v1183_v17 = vld [vmem:[%s1700_s18 + $0x60] sm:$0xff]   ;;  %v1186_v20 = vld [vmem:[%s1693_s0 + $0x68] sm:$0xff]   ;;  %s819_s29 = sshll.u32 %s404_s9, 4  ;;  %s804_s16 = scalar_lea.sflag [#allocation6], %s1690_s15  ;;  %s1748_s29 = int_to_ptr.vmem [resolvable:$true] %s819_s29 }
  0x9e   : > { %v1180_v14 = vld [vmem:[%s1693_s0 + $0x18] sm:$0xff]   ;;  %v1184_v18 = vld [vmem:[%s1693_s0 + $0x20] sm:$0xff]   ;;  %v1187_v21 = vld [vmem:[%s1700_s18 + $0x68] sm:$0xff]   ;;  %s1318_s2 = scalar_lea.vmem %s1748_s29, 128  ;;  %p1854_p4 = scmp.ne.s32.totalorder %s1826_s8, 0 }
  0x9f   : > { %1034 = vmatpush3.bf16.msra.mxu0 %v1172_v6  ;;  %v1181_v15 = vld [vmem:[%s1700_s18 + $0x18] sm:$0xff]   ;;  %v1185_v19 = vld [vmem:[%s1700_s18 + $0x20] sm:$0xff]   ;;  %v1188_v22 = vld [vmem:[%s1693_s0 + $0x28] sm:$0xff]   ;;  %p1319_p11 = scmp.ne.s32.totalorder %s1748_s29, %s1318_s2  ;;  %s1417_s24 = smov [#allocation11]  }
  0xa0   : > { %1056 = vmatpush3.bf16.msra.mxu1 %v1173_v7  ;;  %1035 = vmatprep.subr.bf16.mxu0 %v1174_v8  ;;  %v1189_v23 = vld [vmem:[%s1700_s18 + $0x28] sm:$0xff]   ;;  %v1190_v24 = vld [vmem:[%s1693_s0 + $0x70] sm:$0xff]   ;;  %v1194_v28 = vld [vmem:[%s1693_s0 + $0x78] sm:$0xff]   ;;  %s1322_s13 = sshll.u32 %s1417_s24, 4  ;;  %s1323_s13 = int_to_ptr.vmem [resolvable:$false] %s1322_s13 }
  0xa1   : > { %1057 = vmatprep.subr.bf16.mxu1 %v1175_v9  ;;  %v1191_v25 = vld [vmem:[%s1700_s18 + $0x70] sm:$0xff]   ;;  %v1195_v29 = vld [vmem:[%s1700_s18 + $0x78] sm:$0xff]   ;;  %s1746_s30 = scalar_lea.hbm %s1853_s20, %s1028_s14  ;;  %p1320_p12 = pnand %p1319_p11, %p1854_p4 }
  0xa2   : > { %v1192_v26 = vld [vmem:[%s1693_s0 + $0x30] sm:$0xff]   ;;  %v1196_v30 = vld [vmem:[%s1693_s0 + $0x38] sm:$0xff]   ;;  %s1324_s10 = scalar_lea.vmem %s1323_s13, 256  ;;  %p1325_p1 = scmp.lt.s32.totalorder %s1748_s29, %s1323_s13 }
  0xa3   : > { %1036 = vmatpush3.bf16.msra.mxu0 %v1176_v10  ;;  %v1193_v27 = vld [vmem:[%s1700_s18 + $0x30] sm:$0xff]   ;;  %v1197_v31 = vld [vmem:[%s1700_s18 + $0x38] sm:$0xff]   ;;  %p1321_p10 = pneg %p1320_p12  ;;  %p1326_p3 = scmp.lt.s32.totalorder %s1324_s10, %s1318_s2 }
  0xa4   : > { %1058 = vmatpush3.bf16.msra.mxu1 %v1177_v11  ;;  %1037 = vmatprep.subr.bf16.mxu0 %v1178_v12  ;;  %v423_v32 = vld [vmem:[#allocation4] sm:$0xff]  ;;  %v602_v33 = vld [vmem:[#allocation7] sm:$0xff] }
  0xa5   : > { %1059 = vmatprep.subr.bf16.mxu1 %v1179_v13  ;;  %v989_v34 = vcombine.low %v423_v32, %v423_v32  ;;  %v990_v35 = vcombine.high %v423_v32, %v423_v32  ;;  %v1007_v36 = vcombine.low %v602_v33, %v602_v33  ;;  %v1008_v37 = vcombine.high %v602_v33, %v602_v33  ;;  %v1025_v42 = vld [vmem:[%s411_s6] ss:$0 sm:$0xff]  ;;  %p1327_p7 = por %p1326_p3, %p1325_p1 }
  0xa6   : > { %v1026_v50 = vld [vmem:[%s414_s19] ss:$0 sm:$0xff] }
  0xa7   : > { %1038 = vmatpush3.bf16.msra.mxu0 %v1180_v14  ;;  %591 = vmatprep.mubr.bf16.mxu0 %v990_v35  ;;  %p1328_p0 = pnand %p1327_p7, %p1321_p10 }
  0xa8   : > { %1060 = vmatpush3.bf16.msra.mxu1 %v1181_v15  ;;  %1039 = vmatprep.subr.bf16.mxu0 %v1182_v16 }
  0xa9   : > { %1061 = vmatprep.subr.bf16.mxu1 %v1183_v17  ;;  %770 = vmatprep.mubr.bf16.mxu1 %v1008_v37 }
  0xab   : > { %1040 = vmatpush3.bf16.msra.mxu0 %v1184_v18 }
  0xac   : > { %1062 = vmatpush3.bf16.msra.mxu1 %v1185_v19  ;;  %1041 = vmatprep.subr.bf16.mxu0 %v1186_v20 }
  0xad   : > { %1063 = vmatprep.subr.bf16.mxu1 %v1187_v21 }
  0xaf   : > { %1042 = vmatpush3.bf16.msra.mxu0 %v1188_v22 }
  0xb0   : > { %1064 = vmatpush3.bf16.msra.mxu1 %v1189_v23  ;;  %1043 = vmatprep.subr.bf16.mxu0 %v1190_v24 }
  0xb1   : > { %1065 = vmatprep.subr.bf16.mxu1 %v1191_v25 }
  0xb3   : > { %1044 = vmatpush3.bf16.msra.mxu0 %v1192_v26 }
  0xb4   : > { %1066 = vmatpush3.bf16.msra.mxu1 %v1193_v27  ;;  %1045 = vmatprep.subr.bf16.mxu0 %v1194_v28 }
  0xb5   : > { %1067 = vmatprep.subr.bf16.mxu1 %v1195_v29 }
  0xb7   : > { %1046 = vmatpush3.bf16.msra.mxu0 %v1196_v30 }
  0xb8   : > { %1068 = vmatpush3.bf16.msra.mxu1 %v1197_v31 }
  0xba   : > { %592 = vmatmul.mubr.bf16.vlgmr.msra.gmra.mrb[0].mxu0 %v989_v34 }
  0xbb   : > { %771 = vmatmul.mubr.bf16.vlgmr.msra.gmra.mrb[0].mxu1 %v1007_v36 }
 0x18d   : > { %v1047_v38 = vpop.f32.mrb[0].mxu0 }
 0x18e   : > { %v1069_v39 = vpop.f32.mrb[0].mxu1  ;;  %v1048_v40 = vpop.f32.mrb[1].mxu0 }
 0x18f   : > { %v1070_v41 = vpop.f32.mrb[1].mxu1  ;;  %v1049_v43 = vadd.f32 %v1048_v40, %v1047_v38  ;;  %v1050_v45 = vpop.f32.mrb[2].mxu0 }
 0x190   : > { %v1071_v44 = vadd.f32 %v1070_v41, %v1069_v39  ;;  %v1072_v46 = vpop.f32.mrb[2].mxu1  ;;  %v1051_v47 = vpop.f32.mrb[3].mxu0 }
 0x191   : > { %v1073_v48 = vpop.f32.mrb[3].mxu1 }
 0x192   : > { %v792_v49 = vmul.f32 %v1071_v44, %v1025_v42 }
 0x194   : > { %v793_v51 = vadd.f32 %v1049_v43, %v792_v49 }
 0x196   : > { %v801_v52 = vadd.f32 %v1026_v50, %v793_v51 }
 0x198   : > { %802 = vst [vmem:[%s404_s9] sm:$0xff] %v801_v52 }
 0x199   : > { %1331 = shalt.err (!%p1328_p0)
}
 0x19a   : > { %s1332_s15 = scalar_lea.hbm %s1746_s30, 128  ;;  %s1336_s18 = scalar_lea.hbm %s1853_s20, 256 }
 0x19b   : > { %p1333_p2 = scmp.ne.s32.totalorder %s1746_s30, %s1332_s15  ;;  %p1337_p6 = scmp.lt.u32.totalorder %s1746_s30, %s1853_s20 }
 0x19c   : > { %p1338_p9 = scmp.lt.u32.totalorder %s1336_s18, %s1332_s15  ;;  %p1340_p11 = scmp.lt.u32.totalorder %s1332_s15, %s1746_s30 }
 0x19d   : > { %p1334_p8 = pnand %p1333_p2, %p1854_p4 }
 0x19e   : > { %p1339_p5 = por %p1338_p9, %p1337_p6 }
 0x19f   : > { %p1335_p13 = pneg %p1334_p8 }
 0x1a0   : > { %p1341_p12 = por %p1340_p11, %p1339_p5 }
 0x1a2   : > { %p1342_p10 = pnand %p1341_p12, %p1335_p13 }
 0x1a4   : > { %1345 = shalt.err (!%p1342_p10)
}
 0x1a5   : > { %1087 = dma.vmem_to_hbm [thread:$0]  (%p1854_p4), %s1748_s29, 128, %s1746_s30, %s804_s16  }
 0x1a6 PF: > { %s1855_s12 = sld [smem:[#allocation16_spill]]  ;;  %s1856_s6 = sld [smem:[#allocation19_spill]] }
 0x1a7   : > { %s1857_s21 = sld [smem:[#allocation18_spill]] }
 0x1ac   : > { %s831_s23 = sand.u32 1, %s1855_s12   ;;  %p1858_p1 = scmp.ne.s32.totalorder %s1856_s6, 0 }
 0x1ad   : > { %p1859_p3 = scmp.ge.s32.totalorder %s1857_s21, 2  ;;  %s832_s26 = scalar_lea.sflag [#allocation6], %s831_s23 }
 0x1af   : > { %p1104_p7 = pnand %p1859_p3, %p1858_p1 }
 0x1b1   : > { %1383 = dma.done.wait (!%p1104_p7), %s832_s26, 128  }
 0x1b2   : > { %1385 = vsyncadd (!%p1104_p7), %s832_s26, 4294967168  ;;  %s21_s26 = sadd.s32 1, %s1857_s21   ;;  %s1860_s19 = sld [smem:[#allocation17_spill]] }
 0x1b3   : > { %p18_p0 = scmp.ge.s32.totalorder %s21_s26, 4   ;;  %s1861_s23 = sld [smem:[#allocation21_spill]] }
 0x1b4   : > { %s1862_s8 = sld [smem:[#allocation20_spill]]  ;;  %s1863_s21 = smov %s1392_s22 }
 0x1b5   : > { %s1865_s24 = smov %s1404_s25  ;;  %20 = sbr.rel (!%p18_p0) target bundleno = 10 (0xa), region = 123 }
 0x1b8   : > { %s1864_s22 = smov %s1860_s19 }
 0x1ba   : > { %s1866_s25 = smov %s1862_s8 }
 0x1bc   :  { %837 = vsyncpa [#allocation5], 1 }
 0x1bd   :  { %839 = vsyncpa [#allocation5 + $0x1], 1 }
 0x1be   :  { %840 = vsyncpa [#allocation8], 1 }
 0x1bf   :  { %841 = vsyncpa [#allocation6], 1 }
 0x1c0   :  { %843 = vsyncpa [#allocation6 + $0x1], 1 }

</bundles_post_ra>
